<compile_context>
chip_gen: v7x
topology: tpu7x:2x2x1
jax: 0.10.0
libtpu: 0.0.40
codegen_flags: <defaults>
</compile_context>

<pallas_src>
import functools

import jax
import jax.numpy as jnp
from jax import lax
from jax.experimental import pallas as pl
from jax.experimental.pallas import tpu as pltpu


# ----------------------------- Pallas kernel --------------------------------
def cp2k_rnn_kernel(x_ref, wgx_ref, bgx_ref, whh_ref, wproj_ref, bproj_ref,
                    out_ref, *, seq_len):
    SB, _ = x_ref.shape
    H4 = wgx_ref.shape[1]
    H = whh_ref.shape[0]
    B = SB // seq_len

    # Input-to-gate matmul for ALL timesteps at once (embedding already folded
    # into wgx / bgx on the host).  (S*B, V2) @ (V2, 4H) + (1, 4H)
    gates_x = (jnp.dot(x_ref[...], wgx_ref[...],
                       preferred_element_type=jnp.float32)
               + bgx_ref[...])
    # TODO(synk): nn.Dropout is identity at p=0 / eval mode, so it is omitted.

    w_hh_t = whh_ref[...]                       # (H, 4H), pre-transposed

    # Fully unrolled LSTM recurrence (PyTorch gate order: i, f, g, o).
    h = jnp.zeros((B, H), jnp.float32)
    c = jnp.zeros((B, H), jnp.float32)
    hs = []
    for t in range(seq_len):
        g = (gates_x[t * B:(t + 1) * B, :]
             + jnp.dot(h, w_hh_t, preferred_element_type=jnp.float32))  # (B, 4H)
        sig = jax.nn.sigmoid(g)                 # one EUP pass over full vreg
        tnh = jnp.tanh(g)                       # one EUP pass over full vreg
        i_g = sig[:, 0 * H:1 * H]
        f_g = sig[:, 1 * H:2 * H]
        g_g = tnh[:, 2 * H:3 * H]
        o_g = sig[:, 3 * H:4 * H]
        c = f_g * c + i_g * g_g
        h = o_g * jnp.tanh(c)
        hs.append(h)
    hseq = jnp.concatenate(hs, axis=0)          # (S*B, H), stays in vregs

    # Fused 3-head projection: (S*B, H) @ (H, 3*O) + (1, 3*O)
    out_ref[...] = (jnp.dot(hseq, wproj_ref[...],
                            preferred_element_type=jnp.float32)
                    + bproj_ref[...])


def cp2k_rnn_forward(x, params):
    S, B, V2 = x.shape
    H = params["w_hh"].shape[1]
    P, O, _ = params["w_proj"].shape            # (3, O, H)

    # Host-side weight prep (one-time, fused by XLA):
    #   emb is only consumed by the LSTM, so fold it into the input weights.
    w_gx = (params["w_ih"] @ params["w_emb"]).T                      # (V2, 4H)
    b_gx = (params["w_ih"] @ params["b_emb"]
            + params["b_ih"] + params["b_hh"])[None, :]              # (1, 4H)
    w_hh_t = params["w_hh"].T                                        # (H, 4H)
    w_proj_t = params["w_proj"].transpose(2, 0, 1).reshape(H, P * O)  # (H, 3*O)
    b_proj = params["b_proj"].reshape(1, P * O)                      # (1, 3*O)

    x_flat = x.reshape(S * B, V2)                                    # lane-dense input

    vmem = pl.BlockSpec(memory_space=pltpu.MemorySpace.VMEM)
    out_flat = pl.pallas_call(
        functools.partial(cp2k_rnn_kernel, seq_len=S),
        out_shape=jax.ShapeDtypeStruct((S * B, P * O), jnp.float32),
        in_specs=[vmem] * 6,
        out_specs=vmem,
    )(x_flat, w_gx, b_gx, w_hh_t, w_proj_t, b_proj)

    # (S*B, 3*O) -> (3, S, B, O)   (cheap layout fixup in pure JAX)
    return out_flat.reshape(S, B, P, O).transpose(2, 0, 1, 3)


# ------------------------------ pure-JAX reference ---------------------------
def cp2k_rnn_reference(x, params):
    S, B, _ = x.shape
    H = params["w_hh"].shape[1]
    emb = jnp.einsum("sbv,ev->sbe", x, params["w_emb"]) + params["b_emb"]

    def step(carry, x_t):
        h, c = carry
        gates = (x_t @ params["w_ih"].T + params["b_ih"]
                 + h @ params["w_hh"].T + params["b_hh"])
        i_g = jax.nn.sigmoid(gates[:, 0 * H:1 * H])
        f_g = jax.nn.sigmoid(gates[:, 1 * H:2 * H])
        g_g = jnp.tanh(gates[:, 2 * H:3 * H])
        o_g = jax.nn.sigmoid(gates[:, 3 * H:4 * H])
        c_new = f_g * c + i_g * g_g
        h_new = o_g * jnp.tanh(c_new)
        return (h_new, c_new), h_new

    h0 = jnp.zeros((B, H), jnp.float32)
    _, hseq = lax.scan(step, (h0, h0), emb)
    out = (jnp.einsum("sbh,poh->psbo", hseq, params["w_proj"])
           + params["b_proj"][:, None, None, :])
    return out


# ----------------------------------- main ------------------------------------
if __name__ == "__main__":
    # args: VOCAB_SIZE=8, EMB_DIM=32, HIDDEN=32, LAYERS=1, DROPOUT=0.0,
    #       BIDIRECTION=False, RNN_TYPE='LSTM', TYPE='CP2K_RNN', out_channels=4
    S, B = 8, 2
    VOCAB2 = 16       # VOCAB_SIZE * 2
    E, H, O = 32, 32, 4

    key = jax.random.PRNGKey(0)
    ks = jax.random.split(key, 10)
    params = {
        "w_emb":  0.1 * jax.random.normal(ks[0], (E, VOCAB2), jnp.float32),
        "b_emb":  0.1 * jax.random.normal(ks[1], (E,), jnp.float32),
        "w_ih":   0.1 * jax.random.normal(ks[2], (4 * H, E), jnp.float32),
        "w_hh":   0.1 * jax.random.normal(ks[3], (4 * H, H), jnp.float32),
        "b_ih":   0.1 * jax.random.normal(ks[4], (4 * H,), jnp.float32),
        "b_hh":   0.1 * jax.random.normal(ks[5], (4 * H,), jnp.float32),
        "w_proj": 0.1 * jax.random.normal(ks[6], (3, O, H), jnp.float32),
        "b_proj": 0.1 * jax.random.normal(ks[7], (3, O), jnp.float32),
    }
    x = jax.random.normal(ks[8], (S, B, VOCAB2), jnp.float32)

    out = jax.block_until_ready(cp2k_rnn_forward(x, params))
    ref = jax.block_until_ready(cp2k_rnn_reference(x, params))

    assert out.shape == (3, S, B, O), out.shape
    assert jnp.allclose(out, ref, atol=1e-4, rtol=1e-4), float(jnp.max(jnp.abs(out - ref)))
    print("KERNEL_OK")
</pallas_src>

<mosaic_0001>
module attributes {stable_mosaic.version = 11 : i64} {
  func.func @cp2k_rnn_kernel(%arg0: memref<16x16xf32, #tpu.memory_space<vmem>>, %arg1: memref<16x128xf32, #tpu.memory_space<vmem>>, %arg2: memref<1x128xf32, #tpu.memory_space<vmem>>, %arg3: memref<32x128xf32, #tpu.memory_space<vmem>>, %arg4: memref<32x12xf32, #tpu.memory_space<vmem>>, %arg5: memref<1x12xf32, #tpu.memory_space<vmem>>, %arg6: memref<16x12xf32, #tpu.memory_space<vmem>>) attributes {dimension_semantics = [], scalar_prefetch = 0 : i64, scratch_operands = 0 : i64, tpu.core_type = #tpu.core_type<tc>} {
    %c0 = arith.constant 0 : index
    %c0_0 = arith.constant 0 : index
    %0 = vector.load %arg0[%c0, %c0_0] : memref<16x16xf32, #tpu.memory_space<vmem>>, vector<16x16xf32>
    %c0_1 = arith.constant 0 : index
    %c0_2 = arith.constant 0 : index
    %1 = vector.load %arg1[%c0_1, %c0_2] : memref<16x128xf32, #tpu.memory_space<vmem>>, vector<16x128xf32>
    %cst = arith.constant dense<0.000000e+00> : vector<16x128xf32>
    %2 = tpu.matmul %0, %1, %cst {dimension_numbers = #tpu.dot_dimension_numbers<[1], [0], [0], [1], [0, 0, 1, 1], [], []>} : vector<16x16xf32>, vector<16x128xf32>, vector<16x128xf32> -> vector<16x128xf32>
    %c0_3 = arith.constant 0 : index
    %c0_4 = arith.constant 0 : index
    %3 = vector.load %arg2[%c0_3, %c0_4] : memref<1x128xf32, #tpu.memory_space<vmem>>, vector<1x128xf32>
    %4 = vector.broadcast %3 : vector<1x128xf32> to vector<16x128xf32>
    %5 = arith.addf %2, %4 : vector<16x128xf32>
    %c0_5 = arith.constant 0 : index
    %c0_6 = arith.constant 0 : index
    %6 = vector.load %arg3[%c0_5, %c0_6] : memref<32x128xf32, #tpu.memory_space<vmem>>, vector<32x128xf32>
    %cst_7 = arith.constant 0.000000e+00 : f32
    %7 = vector.broadcast %cst_7 : f32 to vector<2x32xf32>
    %cst_8 = arith.constant 0.000000e+00 : f32
    %8 = vector.broadcast %cst_8 : f32 to vector<2x32xf32>
    %9 = vector.extract_strided_slice %5 {offsets = [0, 0], sizes = [2, 128], strides = [1, 1]} : vector<16x128xf32> to vector<2x128xf32>
    %cst_9 = arith.constant dense<0.000000e+00> : vector<2x128xf32>
    %10 = tpu.matmul %7, %6, %cst_9 {dimension_numbers = #tpu.dot_dimension_numbers<[1], [0], [0], [1], [0, 0, 1, 1], [], []>} : vector<2x32xf32>, vector<32x128xf32>, vector<2x128xf32> -> vector<2x128xf32>
    %11 = arith.addf %9, %10 : vector<2x128xf32>
    %12 = arith.negf %11 : vector<2x128xf32>
    %13 = math.exp %12 : vector<2x128xf32>
    %cst_10 = arith.constant 1.000000e+00 : f32
    %14 = vector.broadcast %cst_10 : f32 to vector<2x128xf32>
    %15 = arith.addf %14, %13 : vector<2x128xf32>
    %16 = arith.divf %14, %15 : vector<2x128xf32>
    %17 = math.tanh %11 : vector<2x128xf32>
    %18 = vector.extract_strided_slice %16 {offsets = [0, 0], sizes = [2, 32], strides = [1, 1]} : vector<2x128xf32> to vector<2x32xf32>
    %19 = vector.extract_strided_slice %16 {offsets = [0, 32], sizes = [2, 32], strides = [1, 1]} : vector<2x128xf32> to vector<2x32xf32>
    %20 = vector.extract_strided_slice %17 {offsets = [0, 64], sizes = [2, 32], strides = [1, 1]} : vector<2x128xf32> to vector<2x32xf32>
    %21 = vector.extract_strided_slice %16 {offsets = [0, 96], sizes = [2, 32], strides = [1, 1]} : vector<2x128xf32> to vector<2x32xf32>
    %22 = arith.mulf %19, %8 : vector<2x32xf32>
    %23 = arith.mulf %18, %20 : vector<2x32xf32>
    %24 = arith.addf %22, %23 : vector<2x32xf32>
    %25 = math.tanh %24 : vector<2x32xf32>
    %26 = arith.mulf %21, %25 : vector<2x32xf32>
    %27 = vector.extract_strided_slice %5 {offsets = [2, 0], sizes = [2, 128], strides = [1, 1]} : vector<16x128xf32> to vector<2x128xf32>
    %cst_11 = arith.constant dense<0.000000e+00> : vector<2x128xf32>
    %28 = tpu.matmul %26, %6, %cst_11 {dimension_numbers = #tpu.dot_dimension_numbers<[1], [0], [0], [1], [0, 0, 1, 1], [], []>} : vector<2x32xf32>, vector<32x128xf32>, vector<2x128xf32> -> vector<2x128xf32>
    %29 = arith.addf %27, %28 : vector<2x128xf32>
    %30 = arith.negf %29 : vector<2x128xf32>
    %31 = math.exp %30 : vector<2x128xf32>
    %cst_12 = arith.constant 1.000000e+00 : f32
    %32 = vector.broadcast %cst_12 : f32 to vector<2x128xf32>
    %33 = arith.addf %32, %31 : vector<2x128xf32>
    %34 = arith.divf %32, %33 : vector<2x128xf32>
    %35 = math.tanh %29 : vector<2x128xf32>
    %36 = vector.extract_strided_slice %34 {offsets = [0, 0], sizes = [2, 32], strides = [1, 1]} : vector<2x128xf32> to vector<2x32xf32>
    %37 = vector.extract_strided_slice %34 {offsets = [0, 32], sizes = [2, 32], strides = [1, 1]} : vector<2x128xf32> to vector<2x32xf32>
    %38 = vector.extract_strided_slice %35 {offsets = [0, 64], sizes = [2, 32], strides = [1, 1]} : vector<2x128xf32> to vector<2x32xf32>
    %39 = vector.extract_strided_slice %34 {offsets = [0, 96], sizes = [2, 32], strides = [1, 1]} : vector<2x128xf32> to vector<2x32xf32>
    %40 = arith.mulf %37, %24 : vector<2x32xf32>
    %41 = arith.mulf %36, %38 : vector<2x32xf32>
    %42 = arith.addf %40, %41 : vector<2x32xf32>
    %43 = math.tanh %42 : vector<2x32xf32>
    %44 = arith.mulf %39, %43 : vector<2x32xf32>
    %45 = vector.extract_strided_slice %5 {offsets = [4, 0], sizes = [2, 128], strides = [1, 1]} : vector<16x128xf32> to vector<2x128xf32>
    %cst_13 = arith.constant dense<0.000000e+00> : vector<2x128xf32>
    %46 = tpu.matmul %44, %6, %cst_13 {dimension_numbers = #tpu.dot_dimension_numbers<[1], [0], [0], [1], [0, 0, 1, 1], [], []>} : vector<2x32xf32>, vector<32x128xf32>, vector<2x128xf32> -> vector<2x128xf32>
    %47 = arith.addf %45, %46 : vector<2x128xf32>
    %48 = arith.negf %47 : vector<2x128xf32>
    %49 = math.exp %48 : vector<2x128xf32>
    %cst_14 = arith.constant 1.000000e+00 : f32
    %50 = vector.broadcast %cst_14 : f32 to vector<2x128xf32>
    %51 = arith.addf %50, %49 : vector<2x128xf32>
    %52 = arith.divf %50, %51 : vector<2x128xf32>
    %53 = math.tanh %47 : vector<2x128xf32>
    %54 = vector.extract_strided_slice %52 {offsets = [0, 0], sizes = [2, 32], strides = [1, 1]} : vector<2x128xf32> to vector<2x32xf32>
    %55 = vector.extract_strided_slice %52 {offsets = [0, 32], sizes = [2, 32], strides = [1, 1]} : vector<2x128xf32> to vector<2x32xf32>
    %56 = vector.extract_strided_slice %53 {offsets = [0, 64], sizes = [2, 32], strides = [1, 1]} : vector<2x128xf32> to vector<2x32xf32>
    %57 = vector.extract_strided_slice %52 {offsets = [0, 96], sizes = [2, 32], strides = [1, 1]} : vector<2x128xf32> to vector<2x32xf32>
    %58 = arith.mulf %55, %42 : vector<2x32xf32>
    %59 = arith.mulf %54, %56 : vector<2x32xf32>
    %60 = arith.addf %58, %59 : vector<2x32xf32>
    %61 = math.tanh %60 : vector<2x32xf32>
    %62 = arith.mulf %57, %61 : vector<2x32xf32>
    %63 = vector.extract_strided_slice %5 {offsets = [6, 0], sizes = [2, 128], strides = [1, 1]} : vector<16x128xf32> to vector<2x128xf32>
    %cst_15 = arith.constant dense<0.000000e+00> : vector<2x128xf32>
    %64 = tpu.matmul %62, %6, %cst_15 {dimension_numbers = #tpu.dot_dimension_numbers<[1], [0], [0], [1], [0, 0, 1, 1], [], []>} : vector<2x32xf32>, vector<32x128xf32>, vector<2x128xf32> -> vector<2x128xf32>
    %65 = arith.addf %63, %64 : vector<2x128xf32>
    %66 = arith.negf %65 : vector<2x128xf32>
    %67 = math.exp %66 : vector<2x128xf32>
    %cst_16 = arith.constant 1.000000e+00 : f32
    %68 = vector.broadcast %cst_16 : f32 to vector<2x128xf32>
    %69 = arith.addf %68, %67 : vector<2x128xf32>
    %70 = arith.divf %68, %69 : vector<2x128xf32>
    %71 = math.tanh %65 : vector<2x128xf32>
    %72 = vector.extract_strided_slice %70 {offsets = [0, 0], sizes = [2, 32], strides = [1, 1]} : vector<2x128xf32> to vector<2x32xf32>
    %73 = vector.extract_strided_slice %70 {offsets = [0, 32], sizes = [2, 32], strides = [1, 1]} : vector<2x128xf32> to vector<2x32xf32>
    %74 = vector.extract_strided_slice %71 {offsets = [0, 64], sizes = [2, 32], strides = [1, 1]} : vector<2x128xf32> to vector<2x32xf32>
    %75 = vector.extract_strided_slice %70 {offsets = [0, 96], sizes = [2, 32], strides = [1, 1]} : vector<2x128xf32> to vector<2x32xf32>
    %76 = arith.mulf %73, %60 : vector<2x32xf32>
    %77 = arith.mulf %72, %74 : vector<2x32xf32>
    %78 = arith.addf %76, %77 : vector<2x32xf32>
    %79 = math.tanh %78 : vector<2x32xf32>
    %80 = arith.mulf %75, %79 : vector<2x32xf32>
    %81 = vector.extract_strided_slice %5 {offsets = [8, 0], sizes = [2, 128], strides = [1, 1]} : vector<16x128xf32> to vector<2x128xf32>
    %cst_17 = arith.constant dense<0.000000e+00> : vector<2x128xf32>
    %82 = tpu.matmul %80, %6, %cst_17 {dimension_numbers = #tpu.dot_dimension_numbers<[1], [0], [0], [1], [0, 0, 1, 1], [], []>} : vector<2x32xf32>, vector<32x128xf32>, vector<2x128xf32> -> vector<2x128xf32>
    %83 = arith.addf %81, %82 : vector<2x128xf32>
    %84 = arith.negf %83 : vector<2x128xf32>
    %85 = math.exp %84 : vector<2x128xf32>
    %cst_18 = arith.constant 1.000000e+00 : f32
    %86 = vector.broadcast %cst_18 : f32 to vector<2x128xf32>
    %87 = arith.addf %86, %85 : vector<2x128xf32>
    %88 = arith.divf %86, %87 : vector<2x128xf32>
    %89 = math.tanh %83 : vector<2x128xf32>
    %90 = vector.extract_strided_slice %88 {offsets = [0, 0], sizes = [2, 32], strides = [1, 1]} : vector<2x128xf32> to vector<2x32xf32>
    %91 = vector.extract_strided_slice %88 {offsets = [0, 32], sizes = [2, 32], strides = [1, 1]} : vector<2x128xf32> to vector<2x32xf32>
    %92 = vector.extract_strided_slice %89 {offsets = [0, 64], sizes = [2, 32], strides = [1, 1]} : vector<2x128xf32> to vector<2x32xf32>
    %93 = vector.extract_strided_slice %88 {offsets = [0, 96], sizes = [2, 32], strides = [1, 1]} : vector<2x128xf32> to vector<2x32xf32>
    %94 = arith.mulf %91, %78 : vector<2x32xf32>
    %95 = arith.mulf %90, %92 : vector<2x32xf32>
    %96 = arith.addf %94, %95 : vector<2x32xf32>
    %97 = math.tanh %96 : vector<2x32xf32>
    %98 = arith.mulf %93, %97 : vector<2x32xf32>
    %99 = vector.extract_strided_slice %5 {offsets = [10, 0], sizes = [2, 128], strides = [1, 1]} : vector<16x128xf32> to vector<2x128xf32>
    %cst_19 = arith.constant dense<0.000000e+00> : vector<2x128xf32>
    %100 = tpu.matmul %98, %6, %cst_19 {dimension_numbers = #tpu.dot_dimension_numbers<[1], [0], [0], [1], [0, 0, 1, 1], [], []>} : vector<2x32xf32>, vector<32x128xf32>, vector<2x128xf32> -> vector<2x128xf32>
    %101 = arith.addf %99, %100 : vector<2x128xf32>
    %102 = arith.negf %101 : vector<2x128xf32>
    %103 = math.exp %102 : vector<2x128xf32>
    %cst_20 = arith.constant 1.000000e+00 : f32
    %104 = vector.broadcast %cst_20 : f32 to vector<2x128xf32>
    %105 = arith.addf %104, %103 : vector<2x128xf32>
    %106 = arith.divf %104, %105 : vector<2x128xf32>
    %107 = math.tanh %101 : vector<2x128xf32>
    %108 = vector.extract_strided_slice %106 {offsets = [0, 0], sizes = [2, 32], strides = [1, 1]} : vector<2x128xf32> to vector<2x32xf32>
    %109 = vector.extract_strided_slice %106 {offsets = [0, 32], sizes = [2, 32], strides = [1, 1]} : vector<2x128xf32> to vector<2x32xf32>
    %110 = vector.extract_strided_slice %107 {offsets = [0, 64], sizes = [2, 32], strides = [1, 1]} : vector<2x128xf32> to vector<2x32xf32>
    %111 = vector.extract_strided_slice %106 {offsets = [0, 96], sizes = [2, 32], strides = [1, 1]} : vector<2x128xf32> to vector<2x32xf32>
    %112 = arith.mulf %109, %96 : vector<2x32xf32>
    %113 = arith.mulf %108, %110 : vector<2x32xf32>
    %114 = arith.addf %112, %113 : vector<2x32xf32>
    %115 = math.tanh %114 : vector<2x32xf32>
    %116 = arith.mulf %111, %115 : vector<2x32xf32>
    %117 = vector.extract_strided_slice %5 {offsets = [12, 0], sizes = [2, 128], strides = [1, 1]} : vector<16x128xf32> to vector<2x128xf32>
    %cst_21 = arith.constant dense<0.000000e+00> : vector<2x128xf32>
    %118 = tpu.matmul %116, %6, %cst_21 {dimension_numbers = #tpu.dot_dimension_numbers<[1], [0], [0], [1], [0, 0, 1, 1], [], []>} : vector<2x32xf32>, vector<32x128xf32>, vector<2x128xf32> -> vector<2x128xf32>
    %119 = arith.addf %117, %118 : vector<2x128xf32>
    %120 = arith.negf %119 : vector<2x128xf32>
    %121 = math.exp %120 : vector<2x128xf32>
    %cst_22 = arith.constant 1.000000e+00 : f32
    %122 = vector.broadcast %cst_22 : f32 to vector<2x128xf32>
    %123 = arith.addf %122, %121 : vector<2x128xf32>
    %124 = arith.divf %122, %123 : vector<2x128xf32>
    %125 = math.tanh %119 : vector<2x128xf32>
    %126 = vector.extract_strided_slice %124 {offsets = [0, 0], sizes = [2, 32], strides = [1, 1]} : vector<2x128xf32> to vector<2x32xf32>
    %127 = vector.extract_strided_slice %124 {offsets = [0, 32], sizes = [2, 32], strides = [1, 1]} : vector<2x128xf32> to vector<2x32xf32>
    %128 = vector.extract_strided_slice %125 {offsets = [0, 64], sizes = [2, 32], strides = [1, 1]} : vector<2x128xf32> to vector<2x32xf32>
    %129 = vector.extract_strided_slice %124 {offsets = [0, 96], sizes = [2, 32], strides = [1, 1]} : vector<2x128xf32> to vector<2x32xf32>
    %130 = arith.mulf %127, %114 : vector<2x32xf32>
    %131 = arith.mulf %126, %128 : vector<2x32xf32>
    %132 = arith.addf %130, %131 : vector<2x32xf32>
    %133 = math.tanh %132 : vector<2x32xf32>
    %134 = arith.mulf %129, %133 : vector<2x32xf32>
    %135 = vector.extract_strided_slice %5 {offsets = [14, 0], sizes = [2, 128], strides = [1, 1]} : vector<16x128xf32> to vector<2x128xf32>
    %cst_23 = arith.constant dense<0.000000e+00> : vector<2x128xf32>
    %136 = tpu.matmul %134, %6, %cst_23 {dimension_numbers = #tpu.dot_dimension_numbers<[1], [0], [0], [1], [0, 0, 1, 1], [], []>} : vector<2x32xf32>, vector<32x128xf32>, vector<2x128xf32> -> vector<2x128xf32>
    %137 = arith.addf %135, %136 : vector<2x128xf32>
    %138 = arith.negf %137 : vector<2x128xf32>
    %139 = math.exp %138 : vector<2x128xf32>
    %cst_24 = arith.constant 1.000000e+00 : f32
    %140 = vector.broadcast %cst_24 : f32 to vector<2x128xf32>
    %141 = arith.addf %140, %139 : vector<2x128xf32>
    %142 = arith.divf %140, %141 : vector<2x128xf32>
    %143 = math.tanh %137 : vector<2x128xf32>
    %144 = vector.extract_strided_slice %142 {offsets = [0, 0], sizes = [2, 32], strides = [1, 1]} : vector<2x128xf32> to vector<2x32xf32>
    %145 = vector.extract_strided_slice %142 {offsets = [0, 32], sizes = [2, 32], strides = [1, 1]} : vector<2x128xf32> to vector<2x32xf32>
    %146 = vector.extract_strided_slice %143 {offsets = [0, 64], sizes = [2, 32], strides = [1, 1]} : vector<2x128xf32> to vector<2x32xf32>
    %147 = vector.extract_strided_slice %142 {offsets = [0, 96], sizes = [2, 32], strides = [1, 1]} : vector<2x128xf32> to vector<2x32xf32>
    %148 = arith.mulf %145, %132 : vector<2x32xf32>
    %149 = arith.mulf %144, %146 : vector<2x32xf32>
    %150 = arith.addf %148, %149 : vector<2x32xf32>
    %151 = math.tanh %150 : vector<2x32xf32>
    %152 = arith.mulf %147, %151 : vector<2x32xf32>
    %153 = tpu.concatenate %26, %44, %62, %80, %98, %116, %134, %152 in 0 : vector<2x32xf32>, vector<2x32xf32>, vector<2x32xf32>, vector<2x32xf32>, vector<2x32xf32>, vector<2x32xf32>, vector<2x32xf32>, vector<2x32xf32> -> vector<16x32xf32>
    %c0_25 = arith.constant 0 : index
    %c0_26 = arith.constant 0 : index
    %154 = vector.load %arg4[%c0_25, %c0_26] : memref<32x12xf32, #tpu.memory_space<vmem>>, vector<32x12xf32>
    %cst_27 = arith.constant dense<0.000000e+00> : vector<16x12xf32>
    %155 = tpu.matmul %153, %154, %cst_27 {dimension_numbers = #tpu.dot_dimension_numbers<[1], [0], [0], [1], [0, 0, 1, 1], [], []>} : vector<16x32xf32>, vector<32x12xf32>, vector<16x12xf32> -> vector<16x12xf32>
    %c0_28 = arith.constant 0 : index
    %c0_29 = arith.constant 0 : index
    %156 = vector.load %arg5[%c0_28, %c0_29] : memref<1x12xf32, #tpu.memory_space<vmem>>, vector<1x12xf32>
    %157 = vector.broadcast %156 : vector<1x12xf32> to vector<16x12xf32>
    %158 = arith.addf %155, %157 : vector<16x12xf32>
    %c0_30 = arith.constant 0 : index
    %c0_31 = arith.constant 0 : index
    %159 = vector.load %arg6[%c0_30, %c0_31] : memref<16x12xf32, #tpu.memory_space<vmem>>, vector<16x12xf32>
    tpu.vector_store %arg6[%c0_30, %c0_31], %158 {strides = array<i32>} : memref<16x12xf32, #tpu.memory_space<vmem>>, vector<16x12xf32>,
    return
  }
}

</mosaic_0001>

<bundles_post_ra>
// kernel: tpu_custom_call.1
= control target key start
LH: loop header
LB: loop body
LE: loop exit
PB: predicated region body
PF: predicated region fallthrough
CT: control target
= control target key end

     0   :  { %11 = vsyncpa [#allocation3], 0  ;;  %s1697_s0 = inlined_call_operand.vmem [shape: f32[16,16], index: 0, kind: input, shape index: {}]   ;;  %s1698_s1 = inlined_call_operand.hbm [shape: f32[16,128], index: 1, kind: input, shape index: {}]   ;;  %s1699_s2 = inlined_call_operand.vmem [shape: f32[1,128], index: 2, kind: input, shape index: {}]   ;;  %s1700_s3 = inlined_call_operand.vmem [shape: f32[32,128], index: 3, kind: input, shape index: {}]   ;;  %s1701_s4 = inlined_call_operand.vmem [shape: f32[32,12], index: 4, kind: input, shape index: {}]   ;;  %s1702_s5 = inlined_call_operand.vmem [shape: f32[1,12], index: 5, kind: input, shape index: {}]   ;;  %s1703_s6 = inlined_call_operand.hbm [shape: f32[16,12], index: 6, kind: output, shape index: {}]  }
   0x1   :  { %12 = vsyncpa [#allocation4], 0  ;;  %s1461_s21 = smov [#allocation2]   ;;  %s1413_s25 = scalar_lea.hbm %s1698_s1, 256 }
   0x2   :  { %s20_s22 = sshll.u32 %s1461_s21, 4  ;;  %p1414_p0 = scmp.ne.s32.totalorder %s1698_s1, %s1413_s25  ;;  %s21_s22 = int_to_ptr.vmem [resolvable:$true] %s20_s22 }
   0x3   :  { %p1417_p1 = scmp.lt.u32.totalorder %s1413_s25, %s1698_s1 }
   0x5   :  { %p1419_p2 = pnand %p1417_p1, %p1414_p0 }
   0x7   :  { %1422 = shalt.err (!%p1419_p2)
}
   0x8   :  { %s1423_s30 = scalar_lea.vmem %s21_s22, 256  ;;  %p1428_p4 = scmp.lt.s32.totalorder %s21_s22, %s21_s22 }
   0x9   :  { %p1424_p3 = scmp.ne.s32.totalorder %s21_s22, %s1423_s30  ;;  %p1429_p5 = scmp.lt.s32.totalorder %s1423_s30, %s1423_s30 }
   0xb   :  { %p1430_p6 = por %p1429_p5, %p1428_p4 }
   0xd   :  { %p1431_p7 = pnand %p1430_p6, %p1424_p3 }
   0xf   :  { %1434 = shalt.err (!%p1431_p7)
}
  0x10   :  { %s1462_s7 = smov 128   ;;  %s1463_s8 = smov 8  }
  0x11   :  { %26 = dma.hbm_to_vmem [thread:$0]  %s1698_s1, 256, %s21_s22, [#allocation3], %s1462_s7, %s1462_s7, %s1463_s8  }
  0x12   :  { %1457 = dma.done.wait [#allocation3], 256  }
  0x13   :  { %1458 = vsyncadd [#allocation3], 4294967040  ;;  %v1464_v0 = vmov 0.0|0.0   ;;  %vm1465_vm0 = vmmov 0   ;;  %v1466_v1 = vmov 0.0   ;;  %vm49_vm1 = vcmask 130048  }
  0x14   :  { %1284 = vmatprep.subr.bf16.mxu1 %v1464_v0  ;;  %1189 = vmatprep.mubr.msk.f32.mxu1 %vm1465_vm0, %v1466_v1  ;;  %v40_v2 = vld [vmem:[#allocation2] sm:$0xff]  ;;  %v41_v3 = vld [vmem:[#allocation2 + $0x8] sm:$0xff]  ;;  %v133_v9 = vld [vmem:[%s1700_s3 + $0x10] sm:$0xff]  ;;  %s1467_s22 = smov 64   ;;  %vm135_vm2 = vcmask 261120   ;;  %vm978_vm3 = vcmask 1041408  }
  0x15   :  { %v131_v4 = vld [vmem:[%s1700_s3] sm:$0xff]  ;;  %v1280_v5 = vpack.c.bf16 %v41_v3, %v40_v2  ;;  %v132_v6 = vld [vmem:[%s1700_s3 + $0x8] sm:$0xff]  ;;  %v134_v10 = vld [vmem:[%s1700_s3 + $0x18] sm:$0xff]  ;;  %vm980_vm4 = vcmask 1043456   ;;  %vm982_vm5 = vcmask 1045504   ;;  %vm1083_vm6 = vcmask 97280  }
  0x16   :  { %v38_v7 = vld [vmem:[%s1697_s0] sm:$0xff]  ;;  %v1532_v8 = vpack.c.bf16 %v132_v6, %v131_v4  ;;  %v39_v11 = vld [vmem:[%s1697_s0 + $0x8] sm:$0xff]  ;;  %v1545_v12 = vpack.c.bf16 %v134_v10, %v133_v9 }
  0x17   :  { %1178 = vmatprep.mubr.msk.f32.mxu0 %vm49_vm1, %v38_v7  ;;  %1281 = vmatprep.subr.bf16.mxu0 %v1280_v5  ;;  %v1103_v13 = vld [vmem:[%s1699_s2] ss:$0 sm:$0xff]  ;;  %s1468_s2 = smov 32  }
  0x18   :  { %1286 = vmatpush3.bf16.msra.mxu1 %v1532_v8  ;;  %1283 = vmatpush3.bf16.msra.mxu0 %v1280_v5 }
  0x19   :  { %1287 = vmatprep.subr.bf16.mxu1 %v1464_v0  ;;  %1290 = vmatprep.subr.bf16.mxu0 %v1464_v0 }
  0x1b   :  { %1179 = vmatmul.mubr.msk.f32.vlgmr.msra.gmra.mrb[0].mxu0 %vm49_vm1, %v39_v11 }
  0x1c   :  { %1289 = vmatpush3.bf16.msra.mxu1 %v1545_v12  ;;  %1292 = vmatpush3.bf16.msra.mxu0 %v1532_v8 }
  0x1d   :  { %1293 = vmatprep.subr.bf16.mxu0 %v1464_v0  ;;  %1200 = vmatprep.mubr.msk.f32.mxu0 %vm1465_vm0, %v1466_v1 }
  0x1e   :  { %1296 = vmatprep.subr.bf16.mxu1 %v1464_v0 }
  0x1f   :  { %1190 = vmatmul.mubr.f32.vlgmr.msra.gmra.mrb[0].mxu1 %v1466_v1 }
  0x20   :  { %1295 = vmatpush3.bf16.msra.mxu0 %v1545_v12  ;;  %1298 = vmatpush3.bf16.msra.mxu1 %v1532_v8 }
  0x21   :  { %1299 = vmatprep.subr.bf16.mxu1 %v1464_v0  ;;  %1211 = vmatprep.mubr.msk.f32.mxu1 %vm1465_vm0, %v1466_v1 }
  0x22   :  { %1302 = vmatprep.subr.bf16.mxu0 %v1464_v0 }
  0x24   :  { %1301 = vmatpush3.bf16.msra.mxu1 %v1545_v12 }
  0x25   :  { %1308 = vmatprep.subr.bf16.mxu1 %v1464_v0 }
  0xee   :  { %v1180_v14 = vpop.f32.mrb[0].mxu0 }
  0xef   :  { %v1568_v15 = vadd.f32 %v1180_v14, %v1103_v13  ;;  %v122_v16 = vpop.f32.mrb[1].mxu0 }
  0xf0   :  { %v1570_v17 = vadd.f32 %v1103_v13, %v122_v16 }
  0xf2   :  { %v205_v18 = vpop.f32.mrb[0].mxu1 }
  0xf3   :  { %v209_v19 = vadd.f32 %v205_v18, %v1570_v17  ;;  %v1191_v20 = vpop.f32.mrb[1].mxu1 }
  0xf5   :  { %1349 = vtanh.f32 %v209_v19  ;;  %v1106_v22 = vmul.f32 -1.442695, %v209_v19 }
  0xf7   :  { %1351 = vpow2.f32 %v1106_v22 }
  0xff   :  { %v1350_v21 = vpop.eup %1349 }
 0x100   :  { %219 = vrot.lane.b32.xlu0 %v1350_v21, %s1467_s22 }
 0x101   :  { %v1352_v23 = vpop.eup %1351 }
 0x102   :  { %v213_v24 = vadd.f32 1.0, %v1352_v23 }
 0x104   :  { %1353 = vrcp.f32 %v213_v24 }
 0x10e   :  { %v1354_v25 = vpop.eup %1353 }
 0x10f   :  { %v217_v28 = vmul.f32 0.0, %v1354_v25 }
 0x172   :  { %v220_v26 = vpop.permute.xlu0 %219 }
 0x173   :  { %v222_v27 = vmul.f32 %v1354_v25, %v220_v26 }
 0x175   :  { %224 = vrot.lane.b32.xlu0 %v222_v27, %s1468_s2 }
 0x1e7   :  { %v225_v29 = vpop.permute.xlu0 %224 }
 0x1e8   :  { %v227_v30 = vadd.f32 %v225_v29, %v217_v28 }
 0x1ea   :  { %1355 = vtanh.f32 %v227_v30  ;;  %v321_v46 = vrot.slane %v227_v30, 6 }
 0x1f4   :  { %v1356_v31 = vpop.eup %1355 }
 0x1f5   :  { %230 = vrot.lane.b32.xlu1 %v1356_v31, %s1467_s22 }
 0x267   :  { %v231_v32 = vpop.permute.xlu1 %230 }
 0x268   :  { %v1576_v33 = vmul.f32 %v1354_v25, %v231_v32 }
 0x26a   :  { %235 = vrot.lane.b32.xlu1 %v1576_v33, %s1468_s2 }
 0x2dc   :  { %v236_v34 = vpop.permute.xlu1 %235 }
 0x2dd   :  { %1201 = vmatmul.mubr.msk.f32.vlgmr.msra.gmra.mrb[2].mxu0 %vm135_vm2, %v236_v34 }
 0x2de   :  { %1304 = vmatpush3.bf16.msra.mxu0 %v1532_v8  ;;  %1222 = vmatprep.mubr.msk.f32.mxu0 %vm1465_vm0, %v1466_v1 }
 0x2df   :  { %1305 = vmatprep.subr.bf16.mxu0 %v1464_v0 }
 0x2e2   :  { %1307 = vmatpush3.bf16.msra.mxu0 %v1545_v12 }
 0x2e3   :  { %1314 = vmatprep.subr.bf16.mxu0 %v1464_v0 }
 0x3b0   :  { %v305_v35 = vpop.f32.mrb[2].mxu0 }
 0x3b1   :  { %v310_v36 = vrot.slane %v305_v35, 6  ;;  %v1202_v37 = vpop.f32.mrb[3].mxu0 }
 0x3b3   :  { %v312_v38 = vadd.f32 %v310_v36, %v1570_v17 }
 0x3b5   :  { %1357 = vtanh.f32 %v312_v38  ;;  %v1108_v40 = vmul.f32 -1.442695, %v312_v38 }
 0x3b7   :  { %1359 = vpow2.f32 %v1108_v40 }
 0x3bf   :  { %v1358_v39 = vpop.eup %1357 }
 0x3c0   :  { %325 = vrot.lane.b32.xlu0 %v1358_v39, %s1467_s22 }
 0x3c1   :  { %v1360_v41 = vpop.eup %1359 }
 0x3c2   :  { %v316_v42 = vadd.f32 1.0, %v1360_v41 }
 0x3c4   :  { %1361 = vrcp.f32 %v316_v42 }
 0x3ce   :  { %v1362_v43 = vpop.eup %1361 }
 0x3cf   :  { %v323_v47 = vmul.f32 %v1362_v43, %v321_v46 }
 0x432   :  { %v326_v44 = vpop.permute.xlu0 %325 }
 0x433   :  { %v328_v45 = vmul.f32 %v1362_v43, %v326_v44 }
 0x435   :  { %330 = vrot.lane.b32.xlu1 %v328_v45, %s1468_s2 }
 0x4a7   :  { %v331_v48 = vpop.permute.xlu1 %330 }
 0x4a8   :  { %v333_v49 = vadd.f32 %v331_v48, %v323_v47 }
 0x4aa   :  { %1363 = vtanh.f32 %v333_v49  ;;  %v428_v4 = vrot.slane %v333_v49, 6 }
 0x4b4   :  { %v1364_v50 = vpop.eup %1363 }
 0x4b5   :  { %336 = vrot.lane.b32.xlu0 %v1364_v50, %s1467_s22 }
 0x527   :  { %v337_v51 = vpop.permute.xlu0 %336 }
 0x528   :  { %v339_v52 = vmul.f32 %v1362_v43, %v337_v51 }
 0x52a   :  { %v341_v53 = vrot.slane %v339_v52, 2  ;;  %v979_v13 = vsel %vm978_vm3, %v1576_v33, %v339_v52 }
 0x52c   :  { %342 = vrot.lane.b32.xlu1 %v341_v53, %s1468_s2 }
 0x59e   :  { %v343_v54 = vpop.permute.xlu1 %342 }
 0x59f   :  { %1212 = vmatmul.mubr.msk.f32.vlgmr.msra.gmra.mrb[2].mxu1 %vm135_vm2, %v343_v54 }
 0x5a0   :  { %1310 = vmatpush3.bf16.msra.mxu1 %v1532_v8  ;;  %1233 = vmatprep.mubr.msk.f32.mxu1 %vm1465_vm0, %v1466_v1 }
 0x5a1   :  { %1311 = vmatprep.subr.bf16.mxu1 %v1464_v0 }
 0x5a4   :  { %1313 = vmatpush3.bf16.msra.mxu1 %v1545_v12 }
 0x5a5   :  { %1320 = vmatprep.subr.bf16.mxu1 %v1464_v0 }
 0x672   :  { %v412_v55 = vpop.f32.mrb[2].mxu1 }
 0x673   :  { %v417_v56 = vrot.slane %v412_v55, 4  ;;  %v1213_v57 = vpop.f32.mrb[3].mxu1 }
 0x675   :  { %v419_v58 = vadd.f32 %v417_v56, %v1570_v17 }
 0x677   :  { %1365 = vtanh.f32 %v419_v58  ;;  %v1110_v60 = vmul.f32 -1.442695, %v419_v58 }
 0x679   :  { %1367 = vpow2.f32 %v1110_v60 }
 0x681   :  { %v1366_v59 = vpop.eup %1365 }
 0x682   :  { %432 = vrot.lane.b32.xlu0 %v1366_v59, %s1467_s22 }
 0x683   :  { %v1368_v61 = vpop.eup %1367 }
 0x684   :  { %v423_v62 = vadd.f32 1.0, %v1368_v61 }
 0x686   :  { %1369 = vrcp.f32 %v423_v62 }
 0x690   :  { %v1370_v63 = vpop.eup %1369 }
 0x691   :  { %v430_v5 = vmul.f32 %v1370_v63, %v428_v4 }
 0x6f4   :  { %v433_v2 = vpop.permute.xlu0 %432 }
 0x6f5   :  { %v435_v3 = vmul.f32 %v1370_v63, %v433_v2 }
 0x6f7   :  { %437 = vrot.lane.b32.xlu1 %v435_v3, %s1468_s2 }
 0x769   :  { %v438_v6 = vpop.permute.xlu1 %437 }
 0x76a   :  { %v440_v7 = vadd.f32 %v438_v6, %v430_v5 }
 0x76c   :  { %1371 = vtanh.f32 %v440_v7  ;;  %v535_v30 = vrot.slane %v440_v7, 6 }
 0x776   :  { %v1372_v9 = vpop.eup %1371 }
 0x777   :  { %443 = vrot.lane.b32.xlu0 %v1372_v9, %s1467_s22 }
 0x7e9   :  { %v444_v10 = vpop.permute.xlu0 %443 }
 0x7ea   :  { %v446_v11 = vmul.f32 %v1370_v63, %v444_v10 }
 0x7ec   :  { %v448_v14 = vrot.slane %v446_v11, 4  ;;  %v981_v16 = vsel %vm980_vm4, %v979_v13, %v446_v11 }
 0x7ee   :  { %449 = vrot.lane.b32.xlu1 %v448_v14, %s1468_s2 }
 0x860   :  { %v450_v18 = vpop.permute.xlu1 %449 }
 0x861   :  { %1223 = vmatmul.mubr.msk.f32.vlgmr.msra.gmra.mrb[4].mxu0 %vm135_vm2, %v450_v18 }
 0x862   :  { %1316 = vmatpush3.bf16.msra.mxu0 %v1532_v8  ;;  %1244 = vmatprep.mubr.msk.f32.mxu0 %vm1465_vm0, %v1466_v1 }
 0x863   :  { %1317 = vmatprep.subr.bf16.mxu0 %v1464_v0 }
 0x866   :  { %1319 = vmatpush3.bf16.msra.mxu0 %v1545_v12 }
 0x867   :  { %1326 = vmatprep.subr.bf16.mxu0 %v1464_v0 }
 0x934   :  { %v519_v19 = vpop.f32.mrb[4].mxu0 }
 0x935   :  { %v524_v20 = vrot.slane %v519_v19, 2  ;;  %v1224_v21 = vpop.f32.mrb[5].mxu0 }
 0x937   :  { %v526_v22 = vadd.f32 %v524_v20, %v1570_v17 }
 0x939   :  { %1373 = vtanh.f32 %v526_v22  ;;  %v1112_v24 = vmul.f32 -1.442695, %v526_v22 }
 0x93b   :  { %1375 = vpow2.f32 %v1112_v24 }
 0x943   :  { %v1374_v23 = vpop.eup %1373 }
 0x944   :  { %539 = vrot.lane.b32.xlu0 %v1374_v23, %s1467_s22 }
 0x945   :  { %v1376_v25 = vpop.eup %1375 }
 0x946   :  { %v530_v26 = vadd.f32 1.0, %v1376_v25 }
 0x948   :  { %1377 = vrcp.f32 %v530_v26 }
 0x952   :  { %v1378_v27 = vpop.eup %1377 }
 0x953   :  { %v537_v31 = vmul.f32 %v1378_v27, %v535_v30 }
 0x9b6   :  { %v540_v28 = vpop.permute.xlu0 %539 }
 0x9b7   :  { %v542_v29 = vmul.f32 %v1378_v27, %v540_v28 }
 0x9b9   :  { %544 = vrot.lane.b32.xlu1 %v542_v29, %s1468_s2 }
 0xa2b   :  { %v545_v32 = vpop.permute.xlu1 %544 }
 0xa2c   :  { %v547_v33 = vadd.f32 %v545_v32, %v537_v31 }
 0xa2e   :  { %1379 = vtanh.f32 %v547_v33  ;;  %v639_v49 = vrot.slane %v547_v33, 6 }
 0xa38   :  { %v1380_v17 = vpop.eup %1379 }
 0xa39   :  { %550 = vrot.lane.b32.xlu0 %v1380_v17, %s1467_s22 }
 0xaab   :  { %v551_v34 = vpop.permute.xlu0 %550 }
 0xaac   :  { %v553_v35 = vmul.f32 %v1378_v27, %v551_v34 }
 0xaae   :  { %v555_v36 = vrot.slane %v553_v35, 6  ;;  %v1619_v37 = vsel %vm982_vm5, %v981_v16, %v553_v35 }
 0xab0   :  { %556 = vrot.lane.b32.xlu1 %v555_v36, %s1468_s2 }
 0xb22   :  { %v557_v38 = vpop.permute.xlu1 %556 }
 0xb23   :  { %1234 = vmatmul.mubr.msk.f32.vlgmr.msra.gmra.mrb[4].mxu1 %vm135_vm2, %v557_v38 }
 0xb24   :  { %1322 = vmatpush3.bf16.msra.mxu1 %v1532_v8  ;;  %1255 = vmatprep.mubr.msk.f32.mxu1 %vm1465_vm0, %v1466_v1 }
 0xb25   :  { %1323 = vmatprep.subr.bf16.mxu1 %v1464_v0 }
 0xb28   :  { %1325 = vmatpush3.bf16.msra.mxu1 %v1545_v12 }
 0xbf6   :  { %v626_v39 = vpop.f32.mrb[4].mxu1 }
 0xbf7   :  { %v630_v40 = vadd.f32 %v626_v39, %v1568_v15  ;;  %v1235_v41 = vpop.f32.mrb[5].mxu1 }
 0xbf9   :  { %1381 = vtanh.f32 %v630_v40  ;;  %v1114_v43 = vmul.f32 -1.442695, %v630_v40 }
 0xbfb   :  { %1383 = vpow2.f32 %v1114_v43 }
 0xc03   :  { %v1382_v42 = vpop.eup %1381 }
 0xc04   :  { %643 = vrot.lane.b32.xlu0 %v1382_v42, %s1467_s22 }
 0xc05   :  { %v1384_v44 = vpop.eup %1383 }
 0xc06   :  { %v634_v45 = vadd.f32 1.0, %v1384_v44 }
 0xc08   :  { %1385 = vrcp.f32 %v634_v45 }
 0xc12   :  { %v1386_v46 = vpop.eup %1385 }
 0xc13   :  { %v641_v50 = vmul.f32 %v1386_v46, %v639_v49 }
 0xc76   :  { %v644_v47 = vpop.permute.xlu0 %643 }
 0xc77   :  { %v646_v48 = vmul.f32 %v1386_v46, %v644_v47 }
 0xc79   :  { %648 = vrot.lane.b32.xlu1 %v646_v48, %s1468_s2 }
 0xceb   :  { %v649_v51 = vpop.permute.xlu1 %648 }
 0xcec   :  { %v651_v52 = vadd.f32 %v649_v51, %v641_v50 }
 0xcee   :  { %1387 = vtanh.f32 %v651_v52 }
 0xcf8   :  { %v1388_v53 = vpop.eup %1387 }
 0xcf9   :  { %654 = vrot.lane.b32.xlu0 %v1388_v53, %s1467_s22  ;;  %v988_v53 = vld [vmem:[%s1701_s4 + $0x8] sm:$0xff] }
 0xd6b   :  { %v655_v54 = vpop.permute.xlu0 %654 }
 0xd6c   :  { %v1632_v55 = vmul.f32 %v1386_v46, %v655_v54  ;;  %v989_v54 = vld [vmem:[%s1701_s4 + $0x10] sm:$0xff] }
 0xd6e   :  { %659 = vrot.lane.b32.xlu1 %v1632_v55, %s1468_s2 }
 0xde0   :  { %v660_v56 = vpop.permute.xlu1 %659 }
 0xde1   :  { %1245 = vmatmul.mubr.msk.f32.vlgmr.msra.gmra.mrb[6].mxu0 %vm135_vm2, %v660_v56 }
 0xde2   :  { %1328 = vmatpush3.bf16.msra.mxu0 %v1532_v8  ;;  %1266 = vmatprep.mubr.msk.f32.mxu0 %vm1465_vm0, %v1466_v1 }
 0xde3   :  { %1329 = vmatprep.subr.bf16.mxu0 %v1464_v0  ;;  %v745_v0 = vrot.slane %v651_v52, 6  ;;  %v987_v52 = vld [vmem:[%s1701_s4] sm:$0xff] }
 0xde6   :  { %1331 = vmatpush3.bf16.msra.mxu0 %v1545_v12 }
 0xeb4   :  { %v729_v57 = vpop.f32.mrb[6].mxu0 }
 0xeb5   :  { %v734_v58 = vrot.slane %v729_v57, 6  ;;  %v1246_v59 = vpop.f32.mrb[7].mxu0 }
 0xeb7   :  { %v736_v60 = vadd.f32 %v734_v58, %v1568_v15 }
 0xeb9   :  { %1389 = vtanh.f32 %v736_v60  ;;  %v1116_v62 = vmul.f32 -1.442695, %v736_v60 }
 0xebb   :  { %1391 = vpow2.f32 %v1116_v62  ;;  %v1121_v62 = vld [vmem:[%s1702_s5] ss:$0 sm:$0xff] }
 0xec3   :  { %v1390_v61 = vpop.eup %1389 }
 0xec4   :  { %749 = vrot.lane.b32.xlu0 %v1390_v61, %s1467_s22 }
 0xec5   :  { %v1392_v63 = vpop.eup %1391 }
 0xec6   :  { %v740_v8 = vadd.f32 1.0, %v1392_v63 }
 0xec8   :  { %1393 = vrcp.f32 %v740_v8 }
 0xed2   :  { %v1394_v2 = vpop.eup %1393 }
 0xed3   :  { %v747_v12 = vmul.f32 %v1394_v2, %v745_v0 }
 0xf36   :  { %v750_v1 = vpop.permute.xlu0 %749 }
 0xf37   :  { %v752_v3 = vmul.f32 %v1394_v2, %v750_v1 }
 0xf39   :  { %754 = vrot.lane.b32.xlu1 %v752_v3, %s1468_s2 }
 0xfab   :  { %v755_v4 = vpop.permute.xlu1 %754 }
 0xfac   :  { %v757_v5 = vadd.f32 %v755_v4, %v747_v12 }
 0xfae   :  { %1395 = vtanh.f32 %v757_v5  ;;  %v852_v26 = vrot.slane %v757_v5, 6 }
 0xfb8   :  { %v1396_v6 = vpop.eup %1395 }
 0xfb9   :  { %760 = vrot.lane.b32.xlu0 %v1396_v6, %s1467_s22 }
0x102b   :  { %v761_v7 = vpop.permute.xlu0 %760 }
0x102c   :  { %v763_v9 = vmul.f32 %v1394_v2, %v761_v7 }
0x102e   :  { %v765_v10 = vrot.slane %v763_v9, 2  ;;  %v984_v33 = vsel %vm978_vm3, %v1632_v55, %v763_v9  ;;  %v990_v55 = vld [vmem:[%s1701_s4 + $0x18] sm:$0xff]  ;;  %s1469_s4 = smov [#allocation5]  }
0x102f   :  { %v1336_v56 = vpack.c.bf16 %v990_v55, %v989_v54  ;;  %s1091_s11 = sshll.u32 %s1469_s4, 4  ;;  %s1092_s11 = int_to_ptr.vmem [resolvable:$true] %s1091_s11 }
0x1030   :  { %766 = vrot.lane.b32.xlu1 %v765_v10, %s1468_s2  ;;  %s1435_s12 = scalar_lea.vmem %s1092_s11, 256  ;;  %p1440_p9 = scmp.lt.s32.totalorder %s1092_s11, %s1092_s11 }
0x1031   :  { %p1436_p8 = scmp.ne.s32.totalorder %s1092_s11, %s1435_s12  ;;  %p1441_p10 = scmp.lt.s32.totalorder %s1435_s12, %s1435_s12 }
0x1033   :  { %p1442_p11 = por %p1441_p10, %p1440_p9 }
0x1035   :  { %p1443_p12 = pnand %p1442_p11, %p1436_p8 }
0x10a2   :  { %v767_v11 = vpop.permute.xlu1 %766 }
0x10a3   :  { %1256 = vmatmul.mubr.msk.f32.vlgmr.msra.gmra.mrb[6].mxu1 %vm135_vm2, %v767_v11 }
0x1176   :  { %v836_v13 = vpop.f32.mrb[6].mxu1 }
0x1177   :  { %v841_v14 = vrot.slane %v836_v13, 4  ;;  %v1257_v16 = vpop.f32.mrb[7].mxu1 }
0x1179   :  { %v843_v18 = vadd.f32 %v841_v14, %v1568_v15 }
0x117b   :  { %1397 = vtanh.f32 %v843_v18  ;;  %v1118_v20 = vmul.f32 -1.442695, %v843_v18 }
0x117d   :  { %1399 = vpow2.f32 %v1118_v20 }
0x1185   :  { %v1398_v19 = vpop.eup %1397 }
0x1186   :  { %856 = vrot.lane.b32.xlu0 %v1398_v19, %s1467_s22 }
0x1187   :  { %v1400_v21 = vpop.eup %1399 }
0x1188   :  { %v847_v22 = vadd.f32 1.0, %v1400_v21 }
0x118a   :  { %1401 = vrcp.f32 %v847_v22 }
0x1194   :  { %v1402_v23 = vpop.eup %1401 }
0x1195   :  { %v854_v27 = vmul.f32 %v1402_v23, %v852_v26 }
0x11f8   :  { %v857_v24 = vpop.permute.xlu0 %856 }
0x11f9   :  { %v859_v25 = vmul.f32 %v1402_v23, %v857_v24 }
0x11fb   :  { %861 = vrot.lane.b32.xlu1 %v859_v25, %s1468_s2 }
0x126d   :  { %v862_v28 = vpop.permute.xlu1 %861 }
0x126e   :  { %v864_v29 = vadd.f32 %v862_v28, %v854_v27 }
0x1270   :  { %1403 = vtanh.f32 %v864_v29  ;;  %v959_v48 = vrot.slane %v864_v29, 6 }
0x127a   :  { %v1404_v30 = vpop.eup %1403 }
0x127b   :  { %867 = vrot.lane.b32.xlu0 %v1404_v30, %s1467_s22 }
0x12ed   :  { %v868_v31 = vpop.permute.xlu0 %867 }
0x12ee   :  { %v870_v32 = vmul.f32 %v1402_v23, %v868_v31 }
0x12f0   :  { %v872_v17 = vrot.slane %v870_v32, 4  ;;  %v985_v34 = vsel %vm980_vm4, %v984_v33, %v870_v32 }
0x12f2   :  { %873 = vrot.lane.b32.xlu1 %v872_v17, %s1468_s2 }
0x1364   :  { %v874_v35 = vpop.permute.xlu1 %873 }
0x1365   :  { %1267 = vmatmul.mubr.msk.f32.vlgmr.msra.gmra.mrb[8].mxu0 %vm135_vm2, %v874_v35 }
0x1438   :  { %v943_v36 = vpop.f32.mrb[8].mxu0 }
0x1439   :  { %v948_v38 = vrot.slane %v943_v36, 2  ;;  %v1268_v39 = vpop.f32.mrb[9].mxu0 }
0x143b   :  { %v950_v40 = vadd.f32 %v948_v38, %v1568_v15 }
0x143d   :  { %1405 = vtanh.f32 %v950_v40  ;;  %v1120_v42 = vmul.f32 -1.442695, %v950_v40 }
0x143f   :  { %1407 = vpow2.f32 %v1120_v42 }
0x1447   :  { %v1406_v41 = vpop.eup %1405 }
0x1448   :  { %963 = vrot.lane.b32.xlu0 %v1406_v41, %s1467_s22 }
0x1449   :  { %v1408_v43 = vpop.eup %1407 }
0x144a   :  { %v954_v44 = vadd.f32 1.0, %v1408_v43 }
0x144c   :  { %1409 = vrcp.f32 %v954_v44 }
0x1456   :  { %v1410_v45 = vpop.eup %1409 }
0x1457   :  { %v961_v49 = vmul.f32 %v1410_v45, %v959_v48 }
0x14ba   :  { %v964_v46 = vpop.permute.xlu0 %963 }
0x14bb   :  { %v966_v47 = vmul.f32 %v1410_v45, %v964_v46 }
0x14bd   :  { %968 = vrot.lane.b32.xlu1 %v966_v47, %s1468_s2 }
0x14c1   :  { %1000 = vrot.lane.b32.xlu1 %v1619_v37, %s1468_s2  ;;  %v1332_v37 = vpack.c.bf16 %v988_v53, %v987_v52 }
0x14c3   :  { %1333 = vmatprep.subr.bf16.mxu1 %v1332_v37 }
0x14c4   :  { %1335 = vmatpush3.bf16.msra.mxu1 %v1332_v37 }
0x14c5   :  { %1337 = vmatprep.subr.bf16.mxu1 %v1336_v56 }
0x14c8   :  { %1339 = vmatpush3.bf16.msra.mxu1 %v1336_v56 }
0x152f   :  { %v969_v15 = vpop.permute.xlu1 %968 }
0x1530   :  { %v971_v50 = vadd.f32 %v969_v15, %v961_v49 }
0x1532   :  { %1411 = vtanh.f32 %v971_v50 }
0x1533   :  { %v1001_v51 = vpop.permute.xlu1 %1000 }
0x1534   :  { %1277 = vmatprep.mubr.msk.f32.mxu1 %vm135_vm2, %v1001_v51 }
0x153c   :  { %v1412_v57 = vpop.eup %1411 }
0x153d   :  { %974 = vrot.lane.b32.xlu0 %v1412_v57, %s1467_s22 }
0x15af   :  { %v975_v58 = vpop.permute.xlu0 %974 }
0x15b0   :  { %v977_v59 = vmul.f32 %v1410_v45, %v975_v58 }
0x15b2   :  { %v986_v60 = vsel %vm982_vm5, %v985_v34, %v977_v59 }
0x15b3   :  { %1002 = vrot.lane.b32.xlu0 %v986_v60, %s1468_s2 }
0x1625   :  { %v1003_v61 = vpop.permute.xlu0 %1002 }
0x1626   :  { %1278 = vmatmul.mubr.msk.f32.vlgmr.msra.gmra.mrb[8].mxu1 %vm135_vm2, %v1003_v61 }
0x16f9   :  { %v1279_v63 = vpop.f32.mrb[8].mxu1 }
0x16fa   :  { %v1080_v8 = vadd.f32 %v1279_v63, %v1121_v62  ;;  %v1074_v2 = vpop.f32.mrb[9].mxu1 }
0x16fb   :  { %v1075_v1 = vadd.f32 %v1121_v62, %v1074_v2 }
0x16fc   :  { %1085 = vst.msk [vmem:[#allocation5 + $0x8] sm:$0xff] %vm1083_vm6, %v1080_v8 }
0x16fd   :  { %1084 = vst.msk [vmem:[#allocation5] sm:$0xff] %vm1083_vm6, %v1075_v1 }
0x16fe   :  { %1446 = shalt.err (!%p1443_p12)
}
0x16ff   :  { %s1447_s5 = scalar_lea.hbm %s1703_s6, 256 }
0x1700   :  { %p1448_p13 = scmp.ne.s32.totalorder %s1703_s6, %s1447_s5  ;;  %p1451_p0 = scmp.lt.u32.totalorder %s1447_s5, %s1703_s6 }
0x1702   :  { %p1453_p1 = pnand %p1451_p0, %p1448_p13 }
0x1704   :  { %1456 = shalt.err (!%p1453_p1)
}
0x1705   :  { %1097 = dma.vmem_to_hbm [thread:$0]  %s1092_s11, 256, %s1703_s6, [#allocation4], %s1462_s7, %s1462_s7, %s1463_s8  }
0x1706   :  { %1459 = dma.done.wait [#allocation4], 256  }
0x1707   :  { %1460 = vsyncadd [#allocation4], 4294967040 }
0x1708   :  { %1101 = vsyncpa [#allocation3], 1 }
0x1709   :  { %1102 = vsyncpa [#allocation4], 1 }

</bundles_post_ra>
